<compile_context>
chip_gen: v5e
topology: v5e:2x2
jax: 0.10.0
libtpu: 0.0.40
codegen_flags: <defaults>
</compile_context>

<pallas_src>
import math
import jax
import jax.numpy as jnp
from jax import lax
from jax.experimental import pallas as pl
from jax.experimental.pallas import tpu as pltpu


def upsample_conv1d_kernel(x_ref, ph_ref, nh_ref, w_ref, b_ref, o_ref):
    """Fused nearest-2x upsample + Conv1d(k=3, pad=1) on one (1, TL, C_in) length tile.

    x_ref:  (1, TL, C_in)       current length tile (NWC)
    ph_ref: (1, HB, C_in)       halo block ending just before this tile (last row used)
    nh_ref: (1, HB, C_in)       halo block starting just after this tile (first row used)
    w_ref:  (3*C_in, 2*C_out)   fused block weight: rows = [x_prev | x_cur | x_next] taps,
                                cols = [even | odd]
    b_ref:  (1, 1, 2*C_out)     bias broadcast to both even/odd halves (f32)
    o_ref:  (1, TL, 2*C_out)    lane-dense output: [..., :C_out] = out[2s], [..., C_out:] = out[2s+1]
    """
    t = pl.program_id(1)
    n_t = pl.num_programs(1)

    x = x_ref[...]                      # native dtype, no f32 upcast
    tl = x.shape[1]
    hb = ph_ref.shape[1]

    prev_last = ph_ref[:, hb - 1:hb, :]   # x[t*TL - 1]   (garbage when t == 0 -> masked)
    next_first = nh_ref[:, 0:1, :]        # x[(t+1)*TL]   (garbage when t == nT-1 -> masked)
    zero_row = jnp.zeros_like(prev_last)
    prev_row = jnp.where(t == 0, zero_row, prev_last)          # conv zero-pad at s = -1
    next_row = jnp.where(t == n_t - 1, zero_row, next_first)   # conv zero-pad at s = L

    # Shifted views of the tile (1-row sublane shifts).
    x_prev = jnp.concatenate([prev_row, x[:, :tl - 1, :]], axis=1)   # x[s-1]
    x_next = jnp.concatenate([x[:, 1:, :], next_row], axis=1)        # x[s+1]

    # Nearest-2x upsample folded algebraically into the 3-tap conv:
    #   out[2s]   = w0 @ x[s-1] + (w1 + w2) @ x[s]
    #   out[2s+1] = (w0 + w1) @ x[s] + w2 @ x[s+1]
    # Single MXU dot: [x_prev | x_cur | x_next] (lane concat, K = 3*C_in) against the
    # fused block weight -> (1, TL, 2*C_out) lands directly in the lane-dense output.
    xcat = jnp.concatenate([x_prev, x, x_next], axis=-1)
    y = jnp.einsum('btk,ko->bto', xcat, w_ref[...],
                   preferred_element_type=jnp.float32)
    y = y + b_ref[...]
    o_ref[...] = y.astype(o_ref.dtype)


def _pick_tile_rows(length, c_in, c_out, vmem_budget_bytes=2 << 20):
    """Largest length-tile that divides L, is a multiple of 8 (when tiling), and keeps the
    per-tile f32 working set small enough for every TPU generation (incl. v7x's 64 MiB VMEM)."""
    per_row_bytes = 4 * (6 * c_in + 4 * c_out)   # x + shifted copies + concat + acc + out (f32)
    target = max(8, min(1024, vmem_budget_bytes // max(per_row_bytes, 1)))
    if length <= target:
        return length
    start = int(target) - int(target) % 8
    for tl in range(start, 7, -8):
        if length % tl == 0:
            return tl
    return length   # fallback (e.g. odd L): single tile per batch row


def upsample_forward(x, weight, bias, *, tile_rows=None):
    """x: (B, C_in, L) NCW. weight: (C_out, C_in, 3). bias: (C_out,).
    Returns (B, C_out, 2*L): nearest 2x upsample followed by Conv1d(k=3, pad=1)."""
    B, C_in, L = x.shape
    C_out = weight.shape[0]

    # NCW -> NWC (interface glue only; no padding pass, halo handled in-kernel).
    x_nwc = jnp.transpose(x, (0, 2, 1))

    # Fused block weight, tap sums done in f32 then cast to the activation dtype.
    w = weight.astype(jnp.float32)
    w0 = w[:, :, 0].T                                     # (C_in, C_out)
    w1 = w[:, :, 1].T
    w2 = w[:, :, 2].T
    zeros = jnp.zeros_like(w0)
    wblk = jnp.concatenate([
        jnp.concatenate([w0, zeros], axis=1),             # x_prev -> even only
        jnp.concatenate([w1 + w2, w0 + w1], axis=1),      # x_cur  -> even | odd
        jnp.concatenate([zeros, w2], axis=1),             # x_next -> odd only
    ], axis=0).astype(x.dtype)                            # (3*C_in, 2*C_out)
    b2 = jnp.concatenate([bias, bias]).astype(jnp.float32).reshape(1, 1, 2 * C_out)

    TL = tile_rows if tile_rows is not None else _pick_tile_rows(L, C_in, C_out)
    assert L % TL == 0, "tile_rows must divide L"
    nT = L // TL
    HB = 8 if (TL % 8 == 0) else TL       # halo DMA block (8 rows when sublane-aligned)
    kb = TL // HB                         # halo stride measured in HB-sized blocks
    n_hb = L // HB

    out = pl.pallas_call(
        upsample_conv1d_kernel,
        out_shape=jax.ShapeDtypeStruct((B, L, 2 * C_out), x.dtype),
        grid=(B, nT),
        in_specs=[
            # Current tile.
            pl.BlockSpec((1, TL, C_in), lambda b, t: (b, t, 0)),
            # Halo block ending at row t*TL - 1 (clamped at the first tile; masked in-kernel).
            pl.BlockSpec((1, HB, C_in),
                         lambda b, t: (b, jnp.maximum(t * kb - 1, 0), 0)),
            # Halo block starting at row (t+1)*TL (clamped at the last tile; masked in-kernel).
            pl.BlockSpec((1, HB, C_in),
                         lambda b, t: (b, jnp.minimum((t + 1) * kb, n_hb - 1), 0)),
            # Fused weight / bias stay resident (constant index maps).
            pl.BlockSpec((3 * C_in, 2 * C_out), lambda b, t: (0, 0)),
            pl.BlockSpec((1, 1, 2 * C_out), lambda b, t: (0, 0, 0)),
        ],
        out_specs=pl.BlockSpec((1, TL, 2 * C_out), lambda b, t: (b, t, 0)),
        compiler_params=pltpu.CompilerParams(
            dimension_semantics=("parallel", "parallel")),
    )(x_nwc, x_nwc, x_nwc, wblk, b2)

    # (B, L, 2*C_out) -> interleave even/odd -> (B, 2L, C_out) -> back to NCW.
    y = out.reshape(B, 2 * L, C_out)
    return jnp.transpose(y, (0, 2, 1))


def upsample_reference(x, weight, bias):
    """Pure-JAX reference: nearest 2x upsample + Conv1d(k=3, pad=1), NCW."""
    up = jnp.repeat(x, 2, axis=-1)
    y = lax.conv_general_dilated(
        up, weight, window_strides=(1,), padding=((1, 1),),
        dimension_numbers=('NCH', 'OIH', 'NCH'))
    return y + bias[None, :, None]


if __name__ == "__main__":
    B, L = 2, 16
    channels = 4
    out_channels_arg = None           # module default
    conv_resample = False             # module default
    # Reproduce the module's quirk: comparison is against the raw argument (None),
    # so the default-constructed Upsample has use_conv=True.
    use_conv = conv_resample or (channels != out_channels_arg)
    C_out = channels if out_channels_arg is None else out_channels_arg
    assert use_conv  # this script implements the dims=1 conv path

    key = jax.random.PRNGKey(0)
    kx, kw, kb = jax.random.split(key, 3)
    x = jax.random.normal(kx, (B, channels, L), dtype=jnp.float32)

    # Deterministic Conv1d-style init (uniform with bound 1/sqrt(fan_in)).
    fan_in = channels * 3
    bound = 1.0 / math.sqrt(fan_in)
    weight = jax.random.uniform(kw, (C_out, channels, 3),
                                minval=-bound, maxval=bound, dtype=jnp.float32)
    bias = jax.random.uniform(kb, (C_out,),
                              minval=-bound, maxval=bound, dtype=jnp.float32)

    y = upsample_forward(x, weight, bias)
    y = jax.block_until_ready(y)
    y_ref = upsample_reference(x, weight, bias)
    assert y.shape == (B, C_out, 2 * L), y.shape
    if not jnp.allclose(y, y_ref, atol=1e-5, rtol=1e-5):
        raise AssertionError("Pallas kernel does not match JAX reference (single tile)")

    # Second check: force multiple length tiles so the halo/masking path is exercised.
    L2 = 32
    x2 = jax.random.normal(jax.random.PRNGKey(1), (1, channels, L2), dtype=jnp.float32)
    y2 = jax.block_until_ready(upsample_forward(x2, weight, bias, tile_rows=8))
    y2_ref = upsample_reference(x2, weight, bias)
    if not jnp.allclose(y2, y2_ref, atol=1e-5, rtol=1e-5):
        raise AssertionError("Pallas kernel does not match JAX reference (tiled path)")

    print("KERNEL_OK")
</pallas_src>

<mosaic_0001>
module attributes {stable_mosaic.version = 11 : i64} {
  func.func @upsample_conv1d_kernel(%arg0: i32, %arg1: i32, %arg2: memref<1x16x4xf32, #tpu.memory_space<vmem>>, %arg3: memref<1x8x4xf32, #tpu.memory_space<vmem>>, %arg4: memref<1x8x4xf32, #tpu.memory_space<vmem>>, %arg5: memref<12x8xf32, #tpu.memory_space<vmem>>, %arg6: memref<1x1x8xf32, #tpu.memory_space<vmem>>, %arg7: memref<1x16x8xf32, #tpu.memory_space<vmem>>) attributes {dimension_semantics = [#tpu.dimension_semantics<parallel>, #tpu.dimension_semantics<parallel>], iteration_bounds = array<i64: 2, 1>, scalar_prefetch = 0 : i64, scratch_operands = 0 : i64, tpu.core_type = #tpu.core_type<tc>, window_params = [{transform_indices = @transform_0, window_bounds = array<i64: 1, 16, 4>}, {transform_indices = @transform_1, window_bounds = array<i64: 1, 8, 4>}, {transform_indices = @transform_2, window_bounds = array<i64: 1, 8, 4>}, {pipeline_mode = #tpu.pipeline_mode<synchronous>, transform_indices = @transform_3, window_bounds = array<i64: 12, 8>}, {pipeline_mode = #tpu.pipeline_mode<synchronous>, transform_indices = @transform_4, window_bounds = array<i64: 1, 1, 8>}, {transform_indices = @transform_5, window_bounds = array<i64: 1, 16, 8>}]} {
    %c0 = arith.constant 0 : index
    %c0_0 = arith.constant 0 : index
    %c0_1 = arith.constant 0 : index
    %0 = vector.load %arg2[%c0, %c0_0, %c0_1] : memref<1x16x4xf32, #tpu.memory_space<vmem>>, vector<1x16x4xf32>
    %c0_2 = arith.constant 0 : index
    %c7 = arith.constant 7 : index
    %c0_3 = arith.constant 0 : index
    %1 = vector.load %arg3[%c0_2, %c7, %c0_3] : memref<1x8x4xf32, #tpu.memory_space<vmem>>, vector<1x1x4xf32>
    %c0_4 = arith.constant 0 : index
    %c0_5 = arith.constant 0 : index
    %c0_6 = arith.constant 0 : index
    %2 = vector.load %arg4[%c0_4, %c0_5, %c0_6] : memref<1x8x4xf32, #tpu.memory_space<vmem>>, vector<1x1x4xf32>
    %cst = arith.constant 0.000000e+00 : f32
    %3 = vector.broadcast %cst : f32 to vector<1x1x4xf32>
    %c0_i32 = arith.constant 0 : i32
    %4 = arith.cmpi eq, %arg1, %c0_i32 : i32
    %5 = arith.select %4, %3, %1 : vector<1x1x4xf32>
    %c0_i32_7 = arith.constant 0 : i32
    %6 = arith.cmpi eq, %arg1, %c0_i32_7 : i32
    %7 = arith.select %6, %3, %2 : vector<1x1x4xf32>
    %8 = vector.extract_strided_slice %0 {offsets = [0, 0, 0], sizes = [1, 15, 4], strides = [1, 1, 1]} : vector<1x16x4xf32> to vector<1x15x4xf32>
    %9 = tpu.concatenate %5, %8 in 1 : vector<1x1x4xf32>, vector<1x15x4xf32> -> vector<1x16x4xf32>
    %10 = vector.extract_strided_slice %0 {offsets = [0, 1, 0], sizes = [1, 15, 4], strides = [1, 1, 1]} : vector<1x16x4xf32> to vector<1x15x4xf32>
    %11 = tpu.concatenate %10, %7 in 1 : vector<1x15x4xf32>, vector<1x1x4xf32> -> vector<1x16x4xf32>
    %12 = tpu.concatenate %9, %0, %11 in 2 : vector<1x16x4xf32>, vector<1x16x4xf32>, vector<1x16x4xf32> -> vector<1x16x12xf32>
    %c0_8 = arith.constant 0 : index
    %c0_9 = arith.constant 0 : index
    %13 = vector.load %arg5[%c0_8, %c0_9] : memref<12x8xf32, #tpu.memory_space<vmem>>, vector<12x8xf32>
    "tpu.trace_start"() <{level = 10 : i32, message = "btk,ko->bto"}> : () -> ()
    %cst_10 = arith.constant dense<0.000000e+00> : vector<1x16x8xf32>
    %14 = tpu.matmul %12, %13, %cst_10 {dimension_numbers = #tpu.dot_dimension_numbers<[2], [0], [0, 1], [1], [0, 0, 0, 1, 1, 1], [], []>} : vector<1x16x12xf32>, vector<12x8xf32>, vector<1x16x8xf32> -> vector<1x16x8xf32>
    "tpu.trace_stop"() : () -> ()
    %c0_11 = arith.constant 0 : index
    %c0_12 = arith.constant 0 : index
    %c0_13 = arith.constant 0 : index
    %15 = vector.load %arg6[%c0_11, %c0_12, %c0_13] : memref<1x1x8xf32, #tpu.memory_space<vmem>>, vector<1x1x8xf32>
    %16 = vector.broadcast %15 : vector<1x1x8xf32> to vector<1x16x8xf32>
    %17 = arith.addf %14, %16 : vector<1x16x8xf32>
    %c0_14 = arith.constant 0 : index
    %c0_15 = arith.constant 0 : index
    %c0_16 = arith.constant 0 : index
    %18 = vector.load %arg7[%c0_14, %c0_15, %c0_16] : memref<1x16x8xf32, #tpu.memory_space<vmem>>, vector<1x16x8xf32>
    tpu.vector_store %arg7[%c0_14, %c0_15, %c0_16], %17 {strides = array<i32>} : memref<1x16x8xf32, #tpu.memory_space<vmem>>, vector<1x16x8xf32>,
    return
  }
  func.func @transform_0(%arg0: i32, %arg1: i32) -> (i32, i32, i32) {
    %c0_i32 = arith.constant 0 : i32
    %c0_i32_0 = arith.constant 0 : i32
    return %arg0, %arg1, %c0_i32 : i32, i32, i32
  }
  func.func @transform_1(%arg0: i32, %arg1: i32) -> (i32, i32, i32) {
    %c2_i32 = arith.constant 2 : i32
    %0 = arith.muli %arg1, %c2_i32 : i32
    %c1_i32 = arith.constant 1 : i32
    %1 = arith.subi %0, %c1_i32 : i32
    %c0_i32 = arith.constant 0 : i32
    %2 = arith.maxsi %1, %c0_i32 : i32
    %c0_i32_0 = arith.constant 0 : i32
    %c0_i32_1 = arith.constant 0 : i32
    return %arg0, %2, %c0_i32_0 : i32, i32, i32
  }
  func.func @transform_2(%arg0: i32, %arg1: i32) -> (i32, i32, i32) {
    %c1_i32 = arith.constant 1 : i32
    %0 = arith.addi %arg1, %c1_i32 : i32
    %c2_i32 = arith.constant 2 : i32
    %1 = arith.muli %0, %c2_i32 : i32
    %c1_i32_0 = arith.constant 1 : i32
    %2 = arith.minsi %1, %c1_i32_0 : i32
    %c0_i32 = arith.constant 0 : i32
    %c0_i32_1 = arith.constant 0 : i32
    return %arg0, %2, %c0_i32 : i32, i32, i32
  }
  func.func @transform_3(%arg0: i32, %arg1: i32) -> (i32, i32) {
    %c0_i32 = arith.constant 0 : i32
    %c0_i32_0 = arith.constant 0 : i32
    %c0_i32_1 = arith.constant 0 : i32
    return %c0_i32, %c0_i32_0 : i32, i32
  }
  func.func @transform_4(%arg0: i32, %arg1: i32) -> (i32, i32, i32) {
    %c0_i32 = arith.constant 0 : i32
    %c0_i32_0 = arith.constant 0 : i32
    %c0_i32_1 = arith.constant 0 : i32
    %c0_i32_2 = arith.constant 0 : i32
    return %c0_i32, %c0_i32_0, %c0_i32_1 : i32, i32, i32
  }
  func.func @transform_5(%arg0: i32, %arg1: i32) -> (i32, i32, i32) {
    %c0_i32 = arith.constant 0 : i32
    %c0_i32_0 = arith.constant 0 : i32
    return %arg0, %arg1, %c0_i32 : i32, i32, i32
  }
}

</mosaic_0001>

<bundles_post_ra>
// kernel: tpu_custom_call.1
= control target key start
LH: loop header
LB: loop body
LE: loop exit
PB: predicated region body
PF: predicated region fallthrough
CT: control target
= control target key end

     0   :  { %s704_s18 = smov 0   ;;  %s706_s19 = smov 0   ;;  %s757_s0 = inlined_call_operand.vmem [shape: f32[2,16,4], index: 0, kind: input, shape index: {}]   ;;  %s758_s1 = inlined_call_operand.vmem [shape: f32[2,16,4], index: 1, kind: input, shape index: {}]   ;;  %s759_s2 = inlined_call_operand.vmem [shape: f32[2,16,4], index: 2, kind: input, shape index: {}]   ;;  %s760_s3 = inlined_call_operand.vmem [shape: f32[12,8], index: 3, kind: input, shape index: {}]   ;;  %s761_s4 = inlined_call_operand.vmem [shape: f32[1,1,8], index: 4, kind: input, shape index: {}]   ;;  %s762_s5 = inlined_call_operand.vmem [shape: f32[2,16,8], index: 5, kind: output, shape index: {}]  }
   0x1   :  { %s708_s20 = smov 0  }
   0x2 LB: > { %s27_s1 = sadd.s32 1, %s665_s19  ;;  %p598_p0 = scmp.ge.s32.totalorder %s669_s20, 1  ;;  %s669_s20 = sphi %s708_s20, %s15_s20   ;;  %s665_s19 = sphi %s706_s19, %s764_s19   ;;  %s661_s18 = sphi %s704_s18, %s763_s18  }
   0x3   : > { %p29_p1 = scmp.ge.s32.totalorder %s27_s1, 2  ;;  %p270_p2 = scmp.lt.s32.totalorder %s669_s20, 3 }
   0x5   : > { %s766_s1 = smov (%p29_p1, %s27_s1), 0  ;;  %p271_p3 = pnand %p598_p0, %p270_p2 }
   0x6   : > { %p331_p4 = scmp.lt.s32.totalorder (!%p271_p3), %s661_s18, 1  ;;  %s671_s26 = smov (!%p271_p3), 4  }
   0x7   : > { %274 = sbr.rel (%p271_p3) target bundleno = 272 (0x110), region = 40  ;;  %s672_s27 = smov (!%p271_p3), 8  }
   0xc   : > { %v430_v0 = vld [vmem:[%s760_s3 + $0x8] sm:$0xf]  ;;  %vm442_vm0 = vcmask 1043456   ;;  %s768_s18 = smov (!%p331_p4, %s661_s18), 1  ;;  %vm401_vm1 = vcmask 1046528   ;;  %v673_v6 = vmov 0.0  }
   0xd   : > { %607 = vmatpush.msk.msra.mxu0 %vm442_vm0, %v430_v0  ;;  %617 = vmatpush.msk.msra.mxu1 %vm442_vm0, %v430_v0  ;;  %s612_s22 = sshll.u32 %s768_s18, 4  ;;  %v407_v7 = vrot.slane %v673_v6, 1  ;;  %v429_v9 = vld [vmem:[%s760_s3] sm:$0xff]  ;;  %vm394_vm2 = vcmask 1040384   ;;  %vm423_vm3 = vcmask 31744   ;;  %vm426_vm4 = vcmask 64512  }
   0xe   : > { %s338_s25 = scalar_lea.vmem %s757_s0, %s612_s22  ;;  %vm435_vm5 = vcmask 97280   ;;  %v646_v22 = vld [vmem:[%s761_s4] ss:$0 sm:$0xff]  ;;  %s380_s9 = scalar_lea.vmem %s762_s5, %s612_s22 }
   0xf   : > { %v382_v1 = vld [vmem:[%s338_s25] sm:$0xff]  ;;  %v383_v2 = vld [vmem:[%s338_s25 + $0x8] sm:$0xff]  ;;  %461 = vmatpush.msra.mxu0 %v429_v9  ;;  %618 = vmatpush.msra.mxu1 %v429_v9 }
  0x10   : > { %410 = vrot.lane.b32.xlu0 %v382_v1, %s671_s26  ;;  %v402_v3 = vrot.slane %v382_v1, 1  ;;  %v403_v4 = vrot.slane %v383_v2, 1  ;;  %v396_v10 = vrot.slane %v383_v2, 7  ;;  %v395_v11 = vrot.slane %v382_v1, 7 }
  0x12   : > { %v404_v5 = vsel %vm401_vm1, %v402_v3, %v403_v4  ;;  %v409_v8 = vsel %vm401_vm1, %v403_v4, %v407_v7  ;;  %v397_v12 = vsel %vm394_vm2, %v395_v11, %v396_v10  ;;  %v400_v13 = vsel %vm394_vm2, 0.0, %v395_v11 }
  0x13   : > { %417 = vrot.lane.b32.xlu1 %v404_v5, %s672_s27 }
  0x18   : > { %412 = vrot.lane.b32.xlu0 %v383_v2, %s671_s26 }
  0x1b   : > { %419 = vrot.lane.b32.xlu1 %v409_v8, %s672_s27 }
  0x82   : > { %v411_v14 = vpop.permute.xlu0 %410 }
  0x83   : > { %v424_v15 = vsel %vm423_vm3, %v400_v13, %v411_v14 }
  0x85   : > { %v418_v16 = vpop.permute.xlu1 %417 }
  0x86   : > { %v427_v17 = vsel %vm426_vm4, %v424_v15, %v418_v16 }
  0x87   : > { %608 = vmatmul.msk.f32.vlgmr.msra.gmra.mxu0 %vm435_vm5, %v427_v17 }
  0x8a   : > { %v413_v18 = vpop.permute.xlu0 %412 }
  0x8b   : > { %v425_v19 = vsel %vm423_vm3, %v397_v12, %v413_v18 }
  0x8d   : > { %v420_v20 = vpop.permute.xlu1 %419 }
  0x8e   : > { %v428_v21 = vsel %vm426_vm4, %v425_v19, %v420_v20 }
  0x8f   : > { %609 = vmatmul.msk.f32.vlgmr.msra.gmra.mxu1 %vm435_vm5, %v428_v21 }
 0x104   : > { %v463_v23 = vpop.f32.mrf.mxu0 }
 0x105   : > { %v464_v24 = vadd.f32 %v646_v22, %v463_v23 }
 0x107   : > { %469 = vst.msk [vmem:[%s380_s9] sm:$0xff] %vm426_vm4, %v464_v24 }
 0x10c   : > { %v466_v25 = vpop.f32.mrf.mxu1 }
 0x10d   : > { %v467_v26 = vadd.f32 %v646_v22, %v466_v25 }
 0x10f   : > { %470 = vst.msk [vmem:[%s380_s9 + $0x8] sm:$0xff] %vm426_vm4, %v467_v26 }
 0x110 PF: > { %s15_s20 = sadd.s32 1, %s669_s20   ;;  %s763_s18 = smov %s665_s19 }
 0x111   : > { %p12_p5 = scmp.ge.s32.totalorder %s15_s20, 4   ;;  %s764_s19 = smov %s766_s1 }
 0x113   :  { %14 = sbr.rel (!%p12_p5) target bundleno = 2 (0x2), region = 76 }

</bundles_post_ra>
